<compile_context>
chip_gen: v6e
topology: v6e:2x2x1
jax: 0.10.0
libtpu: 0.0.40
codegen_flags: <defaults>
</compile_context>

<pallas_src>
import functools

import jax
import jax.numpy as jnp
from jax.experimental import pallas as pl
from jax.experimental.pallas import tpu as pltpu

# ---------------- synthetic wrapped-module configuration ----------------
C_IN = 3        # RGB channels after (virtual) stacking / normalization
HID = 32        # hidden channels of the 1x1-conv trunk
C_SEG = 8       # segmentation classes (head 0 -> reverse_one_hot_uint8)
C_AUX = 4       # aux map channels     (head 1 -> returned as-is)
C_HEADS = C_SEG + C_AUX

IMG_H = 16
IMG_W = 16
MAX_TILE = 8192  # pixels per grid step; big tiles amortize ~0.35us/step overhead


def _pick_tile(n):
    """Whole image if it fits one step, else a fixed 8K-pixel tile (cdiv grid,
    masked partial last block).  Any large image gets >= 2 steps -> megacore."""
    return n if n <= MAX_TILE else MAX_TILE


def _fused_kernel(x_ref, wt_ref, wh_ref, seg_ref, aux_ref, xs_ref, hs_ref):
    # x_ref : (C_x, TN)        raw image pixels for this tile (uint8 gray or f32 RGB)
    # wt_ref: (HID, C_x + 1)   folded trunk weights | bias   (f32)
    # wh_ref: (C_HEADS, HID+1) fused head weights | bias     (f32)
    # xs_ref: (C_x + 1, TN)    bf16 scratch: augmented input  [x ; 1]
    # hs_ref: (HID + 1, TN)    bf16 scratch: augmented hidden [relu(h) ; 1]
    c_x = x_ref.shape[0]
    tn = xs_ref.shape[1]

    x = x_ref[...]
    if x.dtype != jnp.float32:                       # uint8 path: zero-extend then int->f32
        x = x.astype(jnp.int32).astype(jnp.float32)
    # Augmented input: channels + a constant-1 row carrying the folded trunk bias.
    xs_ref[0:c_x, :] = x.astype(jnp.bfloat16)
    xs_ref[c_x:c_x + 1, :] = jnp.ones((1, tn), jnp.bfloat16)

    # Trunk 1x1 conv (preprocessing + bias folded) on the MXU: bf16 in, f32 acc.
    wt = wt_ref[...].astype(jnp.bfloat16)            # (HID, C_x+1)
    h = jnp.dot(wt, xs_ref[...], preferred_element_type=jnp.float32)   # (HID, TN)

    # ReLU (f32 on the VPU for v5e compatibility), then augmented hidden [h ; 1].
    hs_ref[0:HID, :] = jnp.maximum(h, 0.0).astype(jnp.bfloat16)
    hs_ref[HID:HID + 1, :] = jnp.ones((1, tn), jnp.bfloat16)

    # Fused seg+aux heads (bias folded into the last K row) on the MXU.
    wh = wh_ref[...].astype(jnp.bfloat16)            # (C_HEADS, HID+1)
    hd = jnp.dot(wh, hs_ref[...], preferred_element_type=jnp.float32)  # (C_HEADS, TN)

    seg = hd[:C_SEG]                                 # (C_SEG, TN)

    # reverse_one_hot_uint8: argmax over the channel (sublane) axis, first-max tie rule.
    maxv = jnp.max(seg, axis=0, keepdims=True)
    ch = jax.lax.broadcasted_iota(jnp.int32, seg.shape, 0)
    idx = jnp.min(jnp.where(seg == maxv, ch, C_SEG), axis=0, keepdims=True)
    idx = jnp.minimum(idx, C_SEG - 1)                # NaN guard: keep class index in range
    seg_ref[...] = idx.astype(jnp.uint8)             # uint8 emitted directly
    aux_ref[...] = hd[C_SEG:C_SEG + C_AUX]


def pack_params(params):
    """One-time (model-load) packing: fold /255, grayscale stacking and ImageNet
    (x-mean)/std into the trunk weight|bias for both input kinds, and fuse both
    heads + biases into a single (C_HEADS, HID+1) matrix."""
    w1, b1 = params["w1"], params["b1"]
    mean, std = params["mean"], params["std"]

    # grayscale uint8 path: x/255 stacked to 3 channels, then (x-mean)/std
    w_g = (w1 / (255.0 * std)[None, :]).sum(axis=1, keepdims=True)            # (HID, 1)
    b_g = b1 - (w1 * (mean / std)[None, :]).sum(axis=1, keepdims=True)        # (HID, 1)
    # rgb float path: (x-mean)/std
    w_r = w1 / std[None, :]                                                   # (HID, 3)
    b_r = b1 - w1 @ (mean / std)[:, None]                                     # (HID, 1)

    wh = jnp.concatenate(
        [jnp.concatenate([params["w_seg"], params["w_aux"]], axis=0),
         jnp.concatenate([params["b_seg"], params["b_aux"]], axis=0)], axis=1)  # (C_HEADS, HID+1)

    return {
        "wt_gray": jnp.concatenate([w_g, b_g], axis=1),   # (HID, 2)
        "wt_rgb": jnp.concatenate([w_r, b_r], axis=1),    # (HID, 4)
        "wh": wh,
    }


@functools.partial(jax.jit, static_argnums=(3, 4))
def _run(x, wt_packed, wh_packed, H, W):
    N = H * W
    TN = _pick_tile(N)
    C_x = x.shape[0]

    seg, aux = pl.pallas_call(
        _fused_kernel,
        out_shape=(
            jax.ShapeDtypeStruct((1, N), jnp.uint8),
            jax.ShapeDtypeStruct((C_AUX, N), jnp.float32),
        ),
        grid=(pl.cdiv(N, TN),),
        in_specs=[
            pl.BlockSpec((C_x, TN), lambda i: (0, i)),            # raw image tile
            pl.BlockSpec((HID, C_x + 1), lambda i: (0, 0)),       # packed trunk w|b
            pl.BlockSpec((C_HEADS, HID + 1), lambda i: (0, 0)),   # packed head w|b
        ],
        out_specs=[
            pl.BlockSpec((1, TN), lambda i: (0, i)),              # seg argmax (uint8)
            pl.BlockSpec((C_AUX, TN), lambda i: (0, i)),          # aux map (f32)
        ],
        scratch_shapes=[
            pltpu.VMEM((C_x + 1, TN), jnp.bfloat16),              # [x ; 1]
            pltpu.VMEM((HID + 1, TN), jnp.bfloat16),              # [relu(h) ; 1]
        ],
        compiler_params=pltpu.CompilerParams(
            dimension_semantics=("parallel",)),
    )(x, wt_packed, wh_packed)

    return seg.reshape(H, W), aux.reshape(C_AUX, H, W)


def script_tuple_inference_forward(inp, packed):
    """Mirrors ScriptTupleInferenceWrapper.forward."""
    if inp.ndim == 2:
        H, W = inp.shape
        x = inp.reshape(1, H * W)                    # raw uint8 pixels straight to kernel
        wt = packed["wt_gray"]
    else:
        C, H, W = inp.shape
        assert C == 3
        x = inp.astype(jnp.float32).reshape(3, H * W)
        wt = packed["wt_rgb"]
    return _run(x, wt, packed["wh"], H, W)


def init_params():
    key = jax.random.PRNGKey(42)
    k1, k2, k3 = jax.random.split(key, 3)
    return {
        "mean": jnp.array([0.485, 0.456, 0.406], dtype=jnp.float32),
        "std": jnp.array([0.229, 0.224, 0.225], dtype=jnp.float32),
        "w1": 0.5 * jax.random.normal(k1, (HID, C_IN), dtype=jnp.float32),
        "b1": 0.01 * jnp.ones((HID, 1), dtype=jnp.float32),
        "w_seg": 0.1 * jax.random.normal(k2, (C_SEG, HID), dtype=jnp.float32),
        "b_seg": jnp.zeros((C_SEG, 1), dtype=jnp.float32),
        "w_aux": 0.1 * jax.random.normal(k3, (C_AUX, HID), dtype=jnp.float32),
        "b_aux": jnp.zeros((C_AUX, 1), dtype=jnp.float32),
    }


def _reference(x_chw, params):
    """Pure-JAX reference with the ORIGINAL (unfolded, f32) math."""
    mean, std = params["mean"], params["std"]
    xn = (x_chw - mean[:, None, None]) / std[:, None, None]
    xf = xn.reshape(3, -1)
    h = jnp.maximum(params["w1"] @ xf + params["b1"], 0.0)
    seg_logits = params["w_seg"] @ h + params["b_seg"]
    aux = params["w_aux"] @ h + params["b_aux"]
    return seg_logits, aux


def _check(seg, aux, seg_logits_ref, aux_ref, H, W):
    assert seg.shape == (H, W) and seg.dtype == jnp.uint8
    assert aux.shape == (C_AUX, H, W) and aux.dtype == jnp.float32
    # aux: bf16 trunk+heads vs pure-f32 reference -> modest tolerance
    assert jnp.allclose(aux.reshape(C_AUX, -1), aux_ref, rtol=1e-1, atol=2e-1)
    # seg: class chosen by the kernel must be (near-)optimal under the f32 logits
    seg_flat = seg.reshape(-1).astype(jnp.int32)
    assert jnp.all(seg_flat < C_SEG)
    picked = jnp.take_along_axis(seg_logits_ref, seg_flat[None, :], axis=0)[0]
    maxv = seg_logits_ref.max(axis=0)
    assert jnp.all(picked >= maxv - 0.5)


if __name__ == "__main__":
    params = init_params()
    packed = pack_params(params)
    key = jax.random.PRNGKey(0)
    k_gray, k_rgb, k_big = jax.random.split(key, 3)

    # --- path 1: 2D grayscale uint8 image (ndim == 2 branch of internal_forward) ---
    inp_gray = jax.random.randint(
        k_gray, (IMG_H, IMG_W), 0, 256, dtype=jnp.int32).astype(jnp.uint8)
    seg_g, aux_g = script_tuple_inference_forward(inp_gray, packed)
    jax.block_until_ready((seg_g, aux_g))

    g = inp_gray.astype(jnp.float32) / 255.0
    seg_logits_ref_g, aux_ref_g = _reference(jnp.stack((g, g, g)), params)
    _check(seg_g, aux_g, seg_logits_ref_g, aux_ref_g, IMG_H, IMG_W)

    # --- path 2: 3-channel float image (shape[0] == 3 branch only) ---
    inp_rgb = jax.random.uniform(k_rgb, (3, IMG_H, IMG_W), dtype=jnp.float32)
    seg_r, aux_r = script_tuple_inference_forward(inp_rgb, packed)
    jax.block_until_ready((seg_r, aux_r))

    seg_logits_ref_r, aux_ref_r = _reference(inp_rgb, params)
    _check(seg_r, aux_r, seg_logits_ref_r, aux_ref_r, IMG_H, IMG_W)

    # --- path 3: larger grayscale image exercising the multi-step cdiv grid
    #     (H*W not a multiple of 128 -> masked partial last block) ---
    Hb, Wb = 120, 100
    inp_big = jax.random.randint(
        k_big, (Hb, Wb), 0, 256, dtype=jnp.int32).astype(jnp.uint8)
    seg_b, aux_b = script_tuple_inference_forward(inp_big, packed)
    jax.block_until_ready((seg_b, aux_b))

    gb = inp_big.astype(jnp.float32) / 255.0
    seg_logits_ref_b, aux_ref_b = _reference(jnp.stack((gb, gb, gb)), params)
    _check(seg_b, aux_b, seg_logits_ref_b, aux_ref_b, Hb, Wb)

    print("KERNEL_OK")
</pallas_src>

<mosaic_0001>
module attributes {stable_mosaic.version = 11 : i64} {
  func.func @_fused_kernel(%arg0: i32, %arg1: memref<1x256xi8, #tpu.memory_space<vmem>>, %arg2: memref<32x2xf32, #tpu.memory_space<vmem>>, %arg3: memref<12x33xf32, #tpu.memory_space<vmem>>, %arg4: memref<1x256xi8, #tpu.memory_space<vmem>>, %arg5: memref<4x256xf32, #tpu.memory_space<vmem>>, %arg6: memref<2x256xbf16, #tpu.memory_space<vmem>>, %arg7: memref<33x256xbf16, #tpu.memory_space<vmem>>) attributes {dimension_semantics = [#tpu.dimension_semantics<parallel>], iteration_bounds = array<i64: 1>, scalar_prefetch = 0 : i64, scratch_operands = 2 : i64, tpu.core_type = #tpu.core_type<tc>, window_params = [{transform_indices = @transform_0, window_bounds = array<i64: 1, 256>}, {pipeline_mode = #tpu.pipeline_mode<synchronous>, transform_indices = @transform_1, window_bounds = array<i64: 32, 2>}, {pipeline_mode = #tpu.pipeline_mode<synchronous>, transform_indices = @transform_2, window_bounds = array<i64: 12, 33>}, {transform_indices = @transform_3, window_bounds = array<i64: 1, 256>}, {transform_indices = @transform_4, window_bounds = array<i64: 4, 256>}]} {
    %c0 = arith.constant 0 : index
    %c0_0 = arith.constant 0 : index
    %0 = vector.load %arg1[%c0, %c0_0] : memref<1x256xi8, #tpu.memory_space<vmem>>, vector<1x256xi8>
    %1 = arith.extui %0 : vector<1x256xi8> to vector<1x256xi32>
    %2 = arith.sitofp %1 : vector<1x256xi32> to vector<1x256xf32>
    %3 = arith.truncf %2 : vector<1x256xf32> to vector<1x256xbf16>
    %c0_1 = arith.constant 0 : index
    %c0_2 = arith.constant 0 : index
    %4 = vector.load %arg6[%c0_1, %c0_2] : memref<2x256xbf16, #tpu.memory_space<vmem>>, vector<1x256xbf16>
    tpu.vector_store %arg6[%c0_1, %c0_2], %3 {strides = array<i32>} : memref<2x256xbf16, #tpu.memory_space<vmem>>, vector<1x256xbf16>,
    %cst = arith.constant 1.000000e+00 : bf16
    %5 = vector.broadcast %cst : bf16 to vector<1x256xbf16>
    %c1 = arith.constant 1 : index
    %c0_3 = arith.constant 0 : index
    %6 = vector.load %arg6[%c1, %c0_3] : memref<2x256xbf16, #tpu.memory_space<vmem>>, vector<1x256xbf16>
    tpu.vector_store %arg6[%c1, %c0_3], %5 {strides = array<i32>} : memref<2x256xbf16, #tpu.memory_space<vmem>>, vector<1x256xbf16>,
    %c0_4 = arith.constant 0 : index
    %c0_5 = arith.constant 0 : index
    %7 = vector.load %arg2[%c0_4, %c0_5] : memref<32x2xf32, #tpu.memory_space<vmem>>, vector<32x2xf32>
    %8 = arith.truncf %7 : vector<32x2xf32> to vector<32x2xbf16>
    %c0_6 = arith.constant 0 : index
    %c0_7 = arith.constant 0 : index
    %9 = vector.load %arg6[%c0_6, %c0_7] : memref<2x256xbf16, #tpu.memory_space<vmem>>, vector<2x256xbf16>
    %cst_8 = arith.constant dense<0.000000e+00> : vector<32x256xf32>
    %10 = tpu.matmul %8, %9, %cst_8 {dimension_numbers = #tpu.dot_dimension_numbers<[1], [0], [0], [1], [0, 0, 1, 1], [], []>} : vector<32x2xbf16>, vector<2x256xbf16>, vector<32x256xf32> -> vector<32x256xf32>
    %cst_9 = arith.constant 0.000000e+00 : f32
    %11 = vector.broadcast %cst_9 : f32 to vector<32x256xf32>
    %12 = arith.maximumf %10, %11 : vector<32x256xf32>
    %13 = arith.truncf %12 : vector<32x256xf32> to vector<32x256xbf16>
    %c0_10 = arith.constant 0 : index
    %c0_11 = arith.constant 0 : index
    %14 = vector.load %arg7[%c0_10, %c0_11] : memref<33x256xbf16, #tpu.memory_space<vmem>>, vector<32x256xbf16>
    tpu.vector_store %arg7[%c0_10, %c0_11], %13 {strides = array<i32>} : memref<33x256xbf16, #tpu.memory_space<vmem>>, vector<32x256xbf16>,
    %cst_12 = arith.constant 1.000000e+00 : bf16
    %15 = vector.broadcast %cst_12 : bf16 to vector<1x256xbf16>
    %c32 = arith.constant 32 : index
    %c0_13 = arith.constant 0 : index
    %16 = vector.load %arg7[%c32, %c0_13] : memref<33x256xbf16, #tpu.memory_space<vmem>>, vector<1x256xbf16>
    tpu.vector_store %arg7[%c32, %c0_13], %15 {strides = array<i32>} : memref<33x256xbf16, #tpu.memory_space<vmem>>, vector<1x256xbf16>,
    %c0_14 = arith.constant 0 : index
    %c0_15 = arith.constant 0 : index
    %17 = vector.load %arg3[%c0_14, %c0_15] : memref<12x33xf32, #tpu.memory_space<vmem>>, vector<12x33xf32>
    %18 = arith.truncf %17 : vector<12x33xf32> to vector<12x33xbf16>
    %c0_16 = arith.constant 0 : index
    %c0_17 = arith.constant 0 : index
    %19 = vector.load %arg7[%c0_16, %c0_17] : memref<33x256xbf16, #tpu.memory_space<vmem>>, vector<33x256xbf16>
    %cst_18 = arith.constant dense<0.000000e+00> : vector<12x256xf32>
    %20 = tpu.matmul %18, %19, %cst_18 {dimension_numbers = #tpu.dot_dimension_numbers<[1], [0], [0], [1], [0, 0, 1, 1], [], []>} : vector<12x33xbf16>, vector<33x256xbf16>, vector<12x256xf32> -> vector<12x256xf32>
    %21 = vector.extract_strided_slice %20 {offsets = [0, 0], sizes = [8, 256], strides = [1, 1]} : vector<12x256xf32> to vector<8x256xf32>
    %cst_19 = arith.constant dense<0xFF800000> : vector<256xf32>
    %22 = vector.multi_reduction <maximumf>, %21, %cst_19 [0] : vector<8x256xf32> to vector<256xf32>
    %23 = vector.shape_cast %22 : vector<256xf32> to vector<1x256xf32>
    %24 = tpu.iota {dimensions = array<i32: 0>} : vector<8x256xi32>
    %25 = vector.broadcast %23 : vector<1x256xf32> to vector<8x256xf32>
    %26 = arith.cmpf oeq, %21, %25 : vector<8x256xf32>
    %c8_i32 = arith.constant 8 : i32
    %27 = vector.broadcast %c8_i32 : i32 to vector<8x256xi32>
    %28 = arith.select %26, %24, %27 : vector<8x256xi1>, vector<8x256xi32>
    %cst_20 = arith.constant dense<2147483647> : vector<256xi32>
    %29 = vector.multi_reduction <minsi>, %28, %cst_20 [0] : vector<8x256xi32> to vector<256xi32>
    %30 = vector.shape_cast %29 : vector<256xi32> to vector<1x256xi32>
    %c7_i32 = arith.constant 7 : i32
    %31 = vector.broadcast %c7_i32 : i32 to vector<1x256xi32>
    %32 = arith.minsi %30, %31 : vector<1x256xi32>
    %33 = arith.trunci %32 : vector<1x256xi32> to vector<1x256xi8>
    %c0_21 = arith.constant 0 : index
    %c0_22 = arith.constant 0 : index
    %34 = vector.load %arg4[%c0_21, %c0_22] : memref<1x256xi8, #tpu.memory_space<vmem>>, vector<1x256xi8>
    tpu.vector_store %arg4[%c0_21, %c0_22], %33 {strides = array<i32>} : memref<1x256xi8, #tpu.memory_space<vmem>>, vector<1x256xi8>,
    %35 = vector.extract_strided_slice %20 {offsets = [8, 0], sizes = [4, 256], strides = [1, 1]} : vector<12x256xf32> to vector<4x256xf32>
    %c0_23 = arith.constant 0 : index
    %c0_24 = arith.constant 0 : index
    %36 = vector.load %arg5[%c0_23, %c0_24] : memref<4x256xf32, #tpu.memory_space<vmem>>, vector<4x256xf32>
    tpu.vector_store %arg5[%c0_23, %c0_24], %35 {strides = array<i32>} : memref<4x256xf32, #tpu.memory_space<vmem>>, vector<4x256xf32>,
    return
  }
  func.func @transform_0(%arg0: i32) -> (i32, i32) {
    %c0_i32 = arith.constant 0 : i32
    %c0_i32_0 = arith.constant 0 : i32
    return %c0_i32, %arg0 : i32, i32
  }
  func.func @transform_1(%arg0: i32) -> (i32, i32) {
    %c0_i32 = arith.constant 0 : i32
    %c0_i32_0 = arith.constant 0 : i32
    %c0_i32_1 = arith.constant 0 : i32
    return %c0_i32, %c0_i32_0 : i32, i32
  }
  func.func @transform_2(%arg0: i32) -> (i32, i32) {
    %c0_i32 = arith.constant 0 : i32
    %c0_i32_0 = arith.constant 0 : i32
    %c0_i32_1 = arith.constant 0 : i32
    return %c0_i32, %c0_i32_0 : i32, i32
  }
  func.func @transform_3(%arg0: i32) -> (i32, i32) {
    %c0_i32 = arith.constant 0 : i32
    %c0_i32_0 = arith.constant 0 : i32
    return %c0_i32, %arg0 : i32, i32
  }
  func.func @transform_4(%arg0: i32) -> (i32, i32) {
    %c0_i32 = arith.constant 0 : i32
    %c0_i32_0 = arith.constant 0 : i32
    return %c0_i32, %arg0 : i32, i32
  }
}

</mosaic_0001>

<bundles_post_ra>
// kernel: _run.1
= control target key start
LH: loop header
LB: loop body
LE: loop exit
PB: predicated region body
PF: predicated region fallthrough
CT: control target
= control target key end

     0   :  { %v31_v0 = vlaneseq  ;;  %vm43_vm0 = vcmask 1040384   ;;  %vm44_vm1 = vsmask.f32 256  ;;  %v400_v2 = vmov 1966171168   ;;  %s487_s0 = inlined_call_operand.vmem [shape: u8[1,256], index: 0, kind: input, shape index: {}]   ;;  %s488_s1 = inlined_call_operand.vmem [shape: f32[32,2], index: 1, kind: input, shape index: {}]   ;;  %s489_s2 = inlined_call_operand.vmem [shape: f32[12,33], index: 2, kind: input, shape index: {}]   ;;  %s490_s4 = inlined_call_operand.vmem [shape: f32[4,256], index: 4, kind: output, shape index: {1}]   ;;  %s491_s3 = inlined_call_operand.vmem [shape: u8[1,256], index: 3, kind: output, shape index: {0}]  }
   0x1   :  { %v371_v1 = vld.sshfl [vmem:[%s487_s0] sm:$0x5 pattern:$0x73625140]  ;;  %v29_v3 = vunpack.c.l.s4 %v400_v2  ;;  %vm46_vm2 = vcmask 1041409   ;;  %vm433_vm4 = vmand %vm43_vm0, %vm44_vm1  ;;  %v401_v8 = vmov 0  }
   0x2   :  { %v430_v4 = vshrl.u32 %v31_v0, 7  ;;  %vm47_vm3 = vsmask.f32 1280  ;;  %v26_v5 = vunpack.c.l.u8.bf16 %v371_v1  ;;  %137 = vmatprep.mubr.bf16.mxu0 %v401_v8  ;;  %278 = vmatprep.mubr.bf16.mxu1 %v401_v8  ;;  %vm194_vm6 = vcmask 1044484   ;;  %v198_v11 = vld [vmem:[#allocation3 + $0x18] sm:$0x11] }
   0x3   :  { %v30_v6 = vunpack.c.0.s8 %v29_v3  ;;  %vm48_vm5 = vmand %vm46_vm2, %vm47_vm3  ;;  %vm195_vm7 = vsmask.f32 4352  ;;  %v50_v12 = vld [vmem:[#allocation2] sm:$0x3]  ;;  %vm53_vm11 = vsmask.f32 7938 }
   0x4   :  { %vm49_vm8 = vmor %vm48_vm5, %vm433_vm4  ;;  %vm55_vm12 = vsmask.f32 7942  ;;  %v61_v21 = vld [vmem:[%s488_s1] sm:$0xff]  ;;  %v62_v22 = vld [vmem:[%s488_s1 + $0x8] sm:$0xff]  ;;  %vm91_vm1 = vcmask 15360   ;;  %v239_v31 = vsel %vm43_vm0, 65535, %v401_v8 }
   0x5   :  { %v439_v9 = vsub.s32 %v30_v6, %v430_v4  ;;  %vm196_vm9 = vmand %vm194_vm6, %vm195_vm7  ;;  %v65_v25 = vpack.c.bf16 %v62_v22, %v61_v21  ;;  %v63_v26 = vld [vmem:[%s488_s1 + $0x10] sm:$0xff]  ;;  %v64_v27 = vld [vmem:[%s488_s1 + $0x18] sm:$0xff]  ;;  %vm234_vm3 = vcmask 269312  }
   0x6   :  { %vm197_vm10 = vmor %vm196_vm9, %vm433_vm4  ;;  %v66_v28 = vpack.c.bf16 %v64_v27, %v63_v26  ;;  %v201_v54 = vld [vmem:[%s489_s2] sm:$0xff]  ;;  %v202_v55 = vld [vmem:[%s489_s2 + $0x8] sm:$0xf] }
   0x7   :  { %v34_v10 = vrot.slane %v26_v5, %v439_v9  ;;  %v199_v14 = vsel %vm197_vm10, 1065369472, %v198_v11  ;;  %vm54_vm13 = vmand %vm43_vm0, %vm53_vm11  ;;  %v203_v57 = vpack.c.bf16 %v202_v55, %v201_v54 }
   0x8   :  { %200 = vst [vmem:[#allocation3 + $0x18] sm:$0x11] %v199_v14  ;;  %vm56_vm14 = vmand %vm46_vm2, %vm55_vm12 }
   0x9   :  { %v41_v13 = vrot.slane %v34_v10, %v439_v9  ;;  %vm57_vm15 = vmor %vm56_vm14, %vm54_vm13  ;;  %vm349_vm13 = vsmask.f32 0 }
   0xb   :  { %v51_v15 = vsel %vm49_vm8, %v41_v13, %v50_v12 }
   0xc   :  { %52 = vst [vmem:[#allocation2] sm:$0x3] %v51_v15 }
   0xf   :  { %v208_v29 = vld [vmem:[#allocation3 + $0x18] sm:$0x11] }
  0x10   :  { %v385_v30 = vcombine.high %v208_v29, %v208_v29  ;;  %v384_v32 = vcombine.low %v208_v29, %v208_v29 }
  0x12   :  { %v244_v33 = vand.u32 %v385_v30, %v239_v31  ;;  %v241_v34 = vand.u32 %v384_v32, %v239_v31  ;;  %v355_v32 = vld [vmem:[%s491_s3] sm:$0x3] }
  0x13   :  { %v58_v16 = vld [vmem:[#allocation2] sm:$0x3] }
  0x14   :  { %v59_v17 = vsel %vm57_vm15, 1065369472, %v58_v16  ;;  %256 = vmatprep.subr.bf16.mxu1 %v244_v33  ;;  %vm352_vm15 = vsmask.f32 1024 }
  0x15   :  { %60 = vst [vmem:[#allocation2] sm:$0x3] %v59_v17  ;;  %257 = vmatpush1.bf16.msra.mxu1 %v241_v34 }
  0x1c   :  { %v372_v18 = vld.sshfl [vmem:[#allocation2] sm:$0x11 pattern:$0x75316420] }
  0x1d   :  { %v76_v19 = vcombine.high %v372_v18, %v372_v18  ;;  %v83_v20 = vrot.slane %v372_v18, %v439_v9 }
  0x1f   :  { %v90_v23 = vrot.slane %v76_v19, %v439_v9  ;;  %v100_v24 = vsel %vm43_vm0, %v83_v20, 0 }
  0x21   :  { %373 = vmatprep.subr.msk.bf16.mxu0 %vm43_vm0, %v90_v23 }
  0x22   :  { %120 = vmatpush1.bf16.msra.mxu0 %v100_v24 }
  0x25   :  { %374 = vmatmul.mubr.msk.bf16.vlgmr.msra.gmra.mxu0 %vm91_vm1, %v65_v25 }
  0x26   :  { %147 = vmatprep.mubr.bf16.mxu0 %v401_v8 }
  0x2d   :  { %375 = vmatmul.mubr.msk.bf16.gmra.mxu0 %vm91_vm1, %v66_v28  ;;  %vm350_vm1 = vmand %vm43_vm0, %vm349_vm13 }
  0xe5   :  { %v139_v35 = vpop.f32.mrf.mxu0 }
  0xe6   :  { %v158_v37 = vmax.f32 %v139_v35, 0.0 }
  0xe7   :  { %v141_v36 = vpop.f32.mrf.mxu0 }
  0xe8   :  { %v159_v38 = vmax.f32 %v141_v36, 0.0 }
  0xe9   :  { %v143_v39 = vpop.f32.mrf.mxu0 }
  0xea   :  { %v160_v41 = vmax.f32 %v143_v39, 0.0 }
  0xeb   :  { %v145_v40 = vpop.f32.mrf.mxu0 }
  0xec   :  { %v161_v42 = vmax.f32 %v145_v40, 0.0  ;;  %v399_v56 = vpack.c.bf16 %v160_v41, %v158_v37 }
  0xed   :  { %v149_v43 = vpop.f32.mrf.mxu0 }
  0xee   :  { %v162_v45 = vmax.f32 %v149_v43, 0.0  ;;  %v398_v53 = vpack.c.bf16 %v161_v42, %v159_v38 }
  0xef   :  { %v151_v44 = vpop.f32.mrf.mxu0 }
  0xf0   :  { %v163_v46 = vmax.f32 %v151_v44, 0.0 }
  0xf1   :  { %v153_v47 = vpop.f32.mrf.mxu0 }
  0xf2   :  { %v164_v49 = vmax.f32 %v153_v47, 0.0 }
  0xf3   :  { %v155_v48 = vpop.f32.mrf.mxu0 }
  0xf4   :  { %v165_v50 = vmax.f32 %v155_v48, 0.0  ;;  %v397_v52 = vpack.c.bf16 %v164_v49, %v162_v45 }
  0xf6   :  { %v396_v51 = vpack.c.bf16 %v165_v50, %v163_v46 }
  0xf8   :  { %258 = vmatprep.subr.bf16.mxu1 %v396_v51 }
  0xf9   :  { %259 = vmatpush1.bf16.msra.mxu1 %v397_v52 }
  0xfa   :  { %260 = vmatprep.subr.bf16.mxu1 %v398_v53 }
  0xfd   :  { %261 = vmatpush1.bf16.msra.mxu1 %v399_v56 }
 0x100   :  { %386 = vmatmul.mubr.msk.bf16.vlgmr.msra.gmra.mxu1 %vm234_vm3, %v203_v57  ;;  %vm353_vm3 = vmand %vm46_vm2, %vm352_vm15 }
 0x1c0   :  { %v280_v58 = vpop.f32.mrf.mxu1 }
 0x1c1   :  { %v289_v59 = vrot.slane %v280_v58, 4 }
 0x1c2   :  { %v282_v60 = vpop.f32.mrf.mxu1 }
 0x1c3   :  { %v290_v61 = vmax.f32 %v280_v58, %v289_v59  ;;  %v295_v62 = vrot.slane %v282_v60, 4 }
 0x1c4   :  { %v284_v63 = vpop.f32.mrf.mxu1 }
 0x1c5   :  { %v291_v0 = vrot.slane %v290_v61, 2  ;;  %v296_v1 = vmax.f32 %v282_v60, %v295_v62 }
 0x1c6   :  { %v286_v2 = vpop.f32.mrf.mxu1 }
 0x1c7   :  { %v292_v3 = vmax.f32 %v290_v61, %v291_v0  ;;  %v297_v5 = vrot.slane %v296_v1, 2  ;;  %v360_v6 = vcombine.low %v284_v63, %v286_v2 }
 0x1c9   :  { %v293_v7 = vrot.slane %v292_v3, 1  ;;  %v298_v8 = vmax.f32 %v296_v1, %v297_v5  ;;  %362 = vst [vmem:[%s490_s4] sm:$0xff] %v360_v6 }
 0x1cb   :  { %v294_v10 = vmax.f32 %v292_v3, %v293_v7  ;;  %v299_v11 = vrot.slane %v298_v8, 1 }
 0x1cd   :  { %vm303_vm4 = vcmp.eq.f32.partialorder %v280_v58, %v294_v10  ;;  %v300_v12 = vmax.f32 %v298_v8, %v299_v11 }
 0x1ce   :  { %v305_v13 = vsel %vm303_vm4, %v430_v4, 8  ;;  %vm354_vm4 = vmor %vm353_vm3, %vm350_vm1 }
 0x1cf   :  { %v307_v14 = vrot.slane %v305_v13, 4  ;;  %vm304_vm5 = vcmp.eq.f32.partialorder %v282_v60, %v300_v12 }
 0x1d0   :  { %v306_v15 = vsel %vm304_vm5, %v430_v4, 8 }
 0x1d1   :  { %vm308_vm6 = vcmp.lt.s32.totalorder %v305_v13, %v307_v14  ;;  %v316_v16 = vrot.slane %v306_v15, 4 }
 0x1d2   :  { %v309_v17 = vsel %vm308_vm6, %v305_v13, %v307_v14 }
 0x1d3   :  { %v310_v18 = vrot.slane %v309_v17, 2  ;;  %vm317_vm7 = vcmp.lt.s32.totalorder %v306_v15, %v316_v16 }
 0x1d4   :  { %v318_v19 = vsel %vm317_vm7, %v306_v15, %v316_v16 }
 0x1d5   :  { %vm311_vm8 = vcmp.lt.s32.totalorder %v309_v17, %v310_v18  ;;  %v319_v20 = vrot.slane %v318_v19, 2 }
 0x1d6   :  { %v312_v21 = vsel %vm311_vm8, %v309_v17, %v310_v18 }
 0x1d7   :  { %v313_v22 = vrot.slane %v312_v21, 1  ;;  %vm320_vm9 = vcmp.lt.s32.totalorder %v318_v19, %v319_v20 }
 0x1d8   :  { %v321_v23 = vsel %vm320_vm9, %v318_v19, %v319_v20 }
 0x1d9   :  { %vm314_vm10 = vcmp.lt.s32.totalorder %v312_v21, %v313_v22  ;;  %v322_v24 = vrot.slane %v321_v23, 1 }
 0x1da   :  { %v315_v25 = vsel %vm314_vm10, %v312_v21, %v313_v22 }
 0x1db   :  { %vm325_vm11 = vcmp.lt.s32.totalorder %v315_v25, 7  ;;  %vm323_vm12 = vcmp.lt.s32.totalorder %v321_v23, %v322_v24 }
 0x1dc   :  { %v326_v26 = vsel %vm325_vm11, %v315_v25, 7  ;;  %v324_v27 = vsel %vm323_vm12, %v321_v23, %v322_v24 }
 0x1dd   :  { %vm327_vm14 = vcmp.lt.s32.totalorder %v324_v27, 7  ;;  %v329_v28 = vpack.c.b16 %v326_v26, %v326_v26 }
 0x1de   :  { %v328_v4 = vsel %vm327_vm14, %v324_v27, 7 }
 0x1df   :  { %v331_v29 = vpack.c.b16 %v328_v4, %v328_v4 }
 0x1e1   :  { %v387_v30 = vpack.c.b8 %v331_v29, %v329_v28 }
 0x1e3   :  { %v340_v31 = vrot.slane %v387_v30, %v439_v9 }
 0x1e5   :  { %v347_v33 = vrot.slane %v340_v31, %v439_v9 }
 0x1e7   :  { %v356_v34 = vsel %vm354_vm4, %v347_v33, %v355_v32 }
 0x1e8   :  { %357 = vst [vmem:[%s491_s3] sm:$0x3] %v356_v34 }

</bundles_post_ra>
